<compile_context>
chip_gen: v7x
topology: tpu7x:2x2x1
jax: 0.10.0
libtpu: 0.0.40
codegen_flags: <defaults>
</compile_context>

<pallas_src>
import functools

import jax
import jax.numpy as jnp
from jax.experimental import pallas as pl
from jax.experimental.pallas import tpu as pltpu


def _round_up(x: int, m: int) -> int:
    return ((x + m - 1) // m) * m


def _pick_bm(B: int, D: int, target_tile_bytes: int = 2 << 20) -> int:
    """Pick a row tile: as large as possible (<=1024) while one f32 tile stays
    under ~2 MiB, rounded to a multiple of 8 sublanes, no larger than needed."""
    bm_cap = max(8, target_tile_bytes // (D * 4))
    bm = min(1024, bm_cap, _round_up(B, 8))
    bm = max(8, (bm // 8) * 8)
    return bm


def _scale_mod_weights_kernel(dset_ref, x_ref, gate_tbl_ref, o_ref, *,
                              n_delta_sets):
    """dset_ref: (bm, 1) int32, x_ref: (bm, D), gate_tbl_ref: (S, D) f32
    (sigmoid already applied), o_ref: (bm, D)."""
    dset = dset_ref[...]                         # (bm, 1) int32
    x = x_ref[...].astype(jnp.float32)           # (bm, D)
    tbl = gate_tbl_ref[...]                      # (S, D) f32, resident

    # VPU gather: select the matching gate row per batch row. S is tiny, so a
    # static select chain is cheaper than a K-padded one-hot MXU matmul.
    gate = jnp.zeros_like(x)
    for s in range(n_delta_sets):
        gate = jnp.where(dset == s, tbl[s][None, :], gate)

    o_ref[...] = (x * gate).astype(o_ref.dtype)


def scale_modular_weights(in_repr, user_idxs, deltas, user_to_delta_set, *,
                          bm=None):
    """in_repr: [B, D], user_idxs: [B] int, deltas: [S, D] f32,
    user_to_delta_set: [n_users] int  ->  [B, D] (dtype of in_repr)."""
    B, D = in_repr.shape
    S, _ = deltas.shape

    # Compose the two index lookups and hoist the sigmoid outside the kernel.
    dset_ids = user_to_delta_set.astype(jnp.int32)[user_idxs.astype(jnp.int32)]
    # PyTorch would raise on out-of-range indices; clamp so the in-kernel
    # select never silently produces gate == 0.
    dset_ids = jnp.clip(dset_ids, 0, S - 1)
    gate_table = jax.nn.sigmoid(deltas.astype(jnp.float32))      # (S, D)

    if bm is None:
        bm = _pick_bm(B, D)

    # Pad the batch up to a multiple of the row tile (zeros, gather index 0).
    B_pad = _round_up(B, bm)
    x = in_repr
    ids = dset_ids.reshape(B, 1)
    if B_pad != B:
        x = jnp.pad(x, ((0, B_pad - B), (0, 0)))
        ids = jnp.pad(ids, ((0, B_pad - B), (0, 0)))

    kernel = functools.partial(_scale_mod_weights_kernel, n_delta_sets=S)

    grid_spec = pltpu.PrefetchScalarGridSpec(
        num_scalar_prefetch=0,
        grid=(B_pad // bm,),
        in_specs=[
            pl.BlockSpec((bm, 1), lambda i: (i, 0)),   # dset id column (VMEM)
            pl.BlockSpec((bm, D), lambda i: (i, 0)),   # in_repr row tile
            pl.BlockSpec((S, D), lambda i: (0, 0)),    # resident gate table
        ],
        out_specs=pl.BlockSpec((bm, D), lambda i: (i, 0)),
    )

    cost = pl.CostEstimate(
        flops=2 * B_pad * D,                                    # mul + selects
        transcendentals=0,
        bytes_accessed=2 * B_pad * D * 4 + S * D * 4 + B_pad * 4,
    )

    out = pl.pallas_call(
        kernel,
        out_shape=jax.ShapeDtypeStruct((B_pad, D), in_repr.dtype),
        grid_spec=grid_spec,
        compiler_params=pltpu.CompilerParams(
            dimension_semantics=("parallel",)),
        cost_estimate=cost,
    )(ids, x, gate_table)

    return out[:B] if B_pad != B else out


def reference(in_repr, user_idxs, deltas, user_to_delta_set):
    g = deltas[user_to_delta_set[user_idxs]]
    return in_repr * jax.nn.sigmoid(g)


if __name__ == "__main__":
    # Small shapes consistent with the module's forward.
    batch = 8
    latent_dim = 128
    n_delta_sets = 4
    n_users = 16
    init_std = 0.01

    key = jax.random.PRNGKey(0)
    k_x, k_d, k_map, k_u = jax.random.split(key, 4)

    in_repr = jax.random.normal(k_x, (batch, latent_dim), dtype=jnp.float32)
    deltas = init_std * jax.random.normal(k_d, (n_delta_sets, latent_dim),
                                          dtype=jnp.float32)
    user_to_delta_set = jax.random.randint(k_map, (n_users,), 0, n_delta_sets,
                                           dtype=jnp.int32)
    # Enforce the module's assertion: max(user_to_delta_set) == n_delta_sets - 1
    user_to_delta_set = user_to_delta_set.at[-1].set(n_delta_sets - 1)
    user_idxs = jax.random.randint(k_u, (batch,), 0, n_users, dtype=jnp.int32)

    out = scale_modular_weights(in_repr, user_idxs, deltas, user_to_delta_set)
    out = jax.block_until_ready(out)

    ref = reference(in_repr, user_idxs, deltas, user_to_delta_set)
    assert out.shape == (batch, latent_dim)
    assert jnp.allclose(out, ref, atol=1e-5, rtol=1e-5), "mismatch vs reference"

    print("KERNEL_OK")
</pallas_src>

<mosaic_0001>
module attributes {stable_mosaic.version = 11 : i64} {
  func.func @_scale_mod_weights_kernel(%arg0: i32, %arg1: memref<8x1xi32, #tpu.memory_space<vmem>>, %arg2: memref<8x128xf32, #tpu.memory_space<vmem>>, %arg3: memref<4x128xf32, #tpu.memory_space<vmem>>, %arg4: memref<8x128xf32, #tpu.memory_space<vmem>>) attributes {dimension_semantics = [#tpu.dimension_semantics<parallel>], iteration_bounds = array<i64: 1>, scalar_prefetch = 0 : i64, scratch_operands = 0 : i64, tpu.core_type = #tpu.core_type<tc>, window_params = [{transform_indices = @transform_0, window_bounds = array<i64: 8, 1>}, {transform_indices = @transform_1, window_bounds = array<i64: 8, 128>}, {pipeline_mode = #tpu.pipeline_mode<synchronous>, transform_indices = @transform_2, window_bounds = array<i64: 4, 128>}, {transform_indices = @transform_3, window_bounds = array<i64: 8, 128>}]} {
    %c0 = arith.constant 0 : index
    %c0_0 = arith.constant 0 : index
    %0 = vector.load %arg1[%c0, %c0_0] : memref<8x1xi32, #tpu.memory_space<vmem>>, vector<8x1xi32>
    %c0_1 = arith.constant 0 : index
    %c0_2 = arith.constant 0 : index
    %1 = vector.load %arg2[%c0_1, %c0_2] : memref<8x128xf32, #tpu.memory_space<vmem>>, vector<8x128xf32>
    %c0_3 = arith.constant 0 : index
    %c0_4 = arith.constant 0 : index
    %2 = vector.load %arg3[%c0_3, %c0_4] : memref<4x128xf32, #tpu.memory_space<vmem>>, vector<4x128xf32>
    %cst = arith.constant 0.000000e+00 : f32
    %3 = vector.broadcast %cst : f32 to vector<8x128xf32>
    %c0_i32 = arith.constant 0 : i32
    %4 = vector.broadcast %c0_i32 : i32 to vector<8x1xi32>
    %5 = arith.cmpi eq, %0, %4 : vector<8x1xi32>
    %6 = vector.extract_strided_slice %2 {offsets = [0, 0], sizes = [1, 128], strides = [1, 1]} : vector<4x128xf32> to vector<1x128xf32>
    %7 = vector.shape_cast %6 : vector<1x128xf32> to vector<128xf32>
    %8 = vector.shape_cast %7 : vector<128xf32> to vector<1x128xf32>
    %9 = vector.shape_cast %5 : vector<8x1xi1> to vector<8x1xi1>
    %10 = vector.broadcast %9 : vector<8x1xi1> to vector<8x128xi1>
    %11 = vector.shape_cast %8 : vector<1x128xf32> to vector<1x128xf32>
    %12 = vector.broadcast %11 : vector<1x128xf32> to vector<8x128xf32>
    %13 = arith.select %10, %12, %3 : vector<8x128xi1>, vector<8x128xf32>
    %c1_i32 = arith.constant 1 : i32
    %14 = vector.broadcast %c1_i32 : i32 to vector<8x1xi32>
    %15 = arith.cmpi eq, %0, %14 : vector<8x1xi32>
    %16 = vector.extract_strided_slice %2 {offsets = [1, 0], sizes = [1, 128], strides = [1, 1]} : vector<4x128xf32> to vector<1x128xf32>
    %17 = vector.shape_cast %16 : vector<1x128xf32> to vector<128xf32>
    %18 = vector.shape_cast %17 : vector<128xf32> to vector<1x128xf32>
    %19 = vector.shape_cast %15 : vector<8x1xi1> to vector<8x1xi1>
    %20 = vector.broadcast %19 : vector<8x1xi1> to vector<8x128xi1>
    %21 = vector.shape_cast %18 : vector<1x128xf32> to vector<1x128xf32>
    %22 = vector.broadcast %21 : vector<1x128xf32> to vector<8x128xf32>
    %23 = arith.select %20, %22, %13 : vector<8x128xi1>, vector<8x128xf32>
    %c2_i32 = arith.constant 2 : i32
    %24 = vector.broadcast %c2_i32 : i32 to vector<8x1xi32>
    %25 = arith.cmpi eq, %0, %24 : vector<8x1xi32>
    %26 = vector.extract_strided_slice %2 {offsets = [2, 0], sizes = [1, 128], strides = [1, 1]} : vector<4x128xf32> to vector<1x128xf32>
    %27 = vector.shape_cast %26 : vector<1x128xf32> to vector<128xf32>
    %28 = vector.shape_cast %27 : vector<128xf32> to vector<1x128xf32>
    %29 = vector.shape_cast %25 : vector<8x1xi1> to vector<8x1xi1>
    %30 = vector.broadcast %29 : vector<8x1xi1> to vector<8x128xi1>
    %31 = vector.shape_cast %28 : vector<1x128xf32> to vector<1x128xf32>
    %32 = vector.broadcast %31 : vector<1x128xf32> to vector<8x128xf32>
    %33 = arith.select %30, %32, %23 : vector<8x128xi1>, vector<8x128xf32>
    %c3_i32 = arith.constant 3 : i32
    %34 = vector.broadcast %c3_i32 : i32 to vector<8x1xi32>
    %35 = arith.cmpi eq, %0, %34 : vector<8x1xi32>
    %36 = vector.extract_strided_slice %2 {offsets = [3, 0], sizes = [1, 128], strides = [1, 1]} : vector<4x128xf32> to vector<1x128xf32>
    %37 = vector.shape_cast %36 : vector<1x128xf32> to vector<128xf32>
    %38 = vector.shape_cast %37 : vector<128xf32> to vector<1x128xf32>
    %39 = vector.shape_cast %35 : vector<8x1xi1> to vector<8x1xi1>
    %40 = vector.broadcast %39 : vector<8x1xi1> to vector<8x128xi1>
    %41 = vector.shape_cast %38 : vector<1x128xf32> to vector<1x128xf32>
    %42 = vector.broadcast %41 : vector<1x128xf32> to vector<8x128xf32>
    %43 = arith.select %40, %42, %33 : vector<8x128xi1>, vector<8x128xf32>
    %44 = arith.mulf %1, %43 : vector<8x128xf32>
    %c0_5 = arith.constant 0 : index
    %c0_6 = arith.constant 0 : index
    %45 = vector.load %arg4[%c0_5, %c0_6] : memref<8x128xf32, #tpu.memory_space<vmem>>, vector<8x128xf32>
    tpu.vector_store %arg4[%c0_5, %c0_6], %44 {strides = array<i32>} : memref<8x128xf32, #tpu.memory_space<vmem>>, vector<8x128xf32>,
    return
  }
  func.func @transform_0(%arg0: i32) -> (i32, i32) {
    %c0_i32 = arith.constant 0 : i32
    %c0_i32_0 = arith.constant 0 : i32
    return %arg0, %c0_i32 : i32, i32
  }
  func.func @transform_1(%arg0: i32) -> (i32, i32) {
    %c0_i32 = arith.constant 0 : i32
    %c0_i32_0 = arith.constant 0 : i32
    return %arg0, %c0_i32 : i32, i32
  }
  func.func @transform_2(%arg0: i32) -> (i32, i32) {
    %c0_i32 = arith.constant 0 : i32
    %c0_i32_0 = arith.constant 0 : i32
    %c0_i32_1 = arith.constant 0 : i32
    return %c0_i32, %c0_i32_0 : i32, i32
  }
  func.func @transform_3(%arg0: i32) -> (i32, i32) {
    %c0_i32 = arith.constant 0 : i32
    %c0_i32_0 = arith.constant 0 : i32
    return %arg0, %c0_i32 : i32, i32
  }
}

</mosaic_0001>

<bundles_post_ra>
// kernel: tpu_custom_call.1
= control target key start
LH: loop header
LB: loop body
LE: loop exit
PB: predicated region body
PF: predicated region fallthrough
CT: control target
= control target key end

     0   :  { %s149_s0 = inlined_call_operand.vmem [shape: s32[8,1], index: 0, kind: input, shape index: {}]   ;;  %s150_s1 = inlined_call_operand.vmem [shape: f32[8,128], index: 1, kind: input, shape index: {}]   ;;  %s151_s2 = inlined_call_operand.vmem [shape: f32[4,128], index: 2, kind: input, shape index: {}]   ;;  %s152_s3 = inlined_call_operand.hbm [shape: f32[8,128], index: 3, kind: output, shape index: {}]  }
   0x1   :  { %v15_v0 = vld [vmem:[%s149_s0] sm:$0xff] }
   0x2   :  { %8 = vsyncpa [#allocation3], 0  ;;  %v106_v1 = vmov 0   ;;  %vm40_vm0 = vcmp.eq.s32.totalorder %v15_v0, 2  ;;  %vm18_vm1 = vcmp.eq.s32.totalorder %v15_v0, 0  ;;  %vm51_vm2 = vcmp.eq.s32.totalorder %v15_v0, 3 }
   0x3   :  { %81 = vset.pattern.permute.xlu1 %v106_v1  ;;  %80 = vset.pattern.permute.xlu0 %v106_v1  ;;  %vm29_vm3 = vcmp.eq.s32.totalorder %v15_v0, 1  ;;  %v41_v2 = vsel %vm40_vm0, 1, %v106_v1  ;;  %v19_v3 = vsel %vm18_vm1, 1, %v106_v1  ;;  %v52_v4 = vsel %vm51_vm2, 1, %v106_v1  ;;  %v17_v9 = vld [vmem:[%s151_s2] sm:$0xf] }
   0x4   :  { %43 = vperm.xlu1 %81, %v41_v2   ;;  %21 = vperm.xlu0 %80, %v19_v3   ;;  %v30_v5 = vsel %vm29_vm3, 1, %v106_v1  ;;  %v24_v6 = vlaneseq  ;;  %v16_v23 = vld [vmem:[%s150_s1] sm:$0xff]  ;;  %s107_s2 = smov [#allocation2]  }
   0x5   :  { %s70_s17 = sshll.u32 %s107_s2, 4  ;;  %s71_s17 = int_to_ptr.vmem [resolvable:$true] %s70_s17 }
   0x6   :  { %v25_v7 = vshrl.u32 %v24_v6, 7  ;;  %s82_s18 = scalar_lea.vmem %s71_s17, 128  ;;  %p87_p1 = scmp.lt.s32.totalorder %s71_s17, %s71_s17 }
   0x7   :  { %p83_p0 = scmp.ne.s32.totalorder %s71_s17, %s82_s18  ;;  %p88_p2 = scmp.lt.s32.totalorder %s82_s18, %s82_s18 }
   0x8   :  { %54 = vperm.xlu1 %81, %v52_v4   ;;  %32 = vperm.xlu0 %80, %v30_v5   ;;  %v26_v8 = vsub.s32 0, %v25_v7  ;;  %v37_v10 = vsub.s32 1, %v25_v7  ;;  %v48_v11 = vsub.s32 2, %v25_v7  ;;  %v59_v14 = vsub.s32 3, %v25_v7 }
   0x9   :  { %p89_p3 = por %p88_p2, %p87_p1 }
   0xa   :  { %v27_v15 = vrot.slane %v17_v9, %v26_v8  ;;  %v38_v16 = vrot.slane %v17_v9, %v37_v10  ;;  %v49_v17 = vrot.slane %v17_v9, %v48_v11  ;;  %v60_v20 = vrot.slane %v17_v9, %v59_v14 }
   0xb   :  { %p90_p4 = pnand %p89_p3, %p83_p0 }
  0x83   :  { %v44_v12 = vpop.permute.xlu1 %43  ;;  %v22_v13 = vpop.permute.xlu0 %21 }
  0x84   :  { %vm23_vm4 = vcmp.eq.s32.totalorder %v22_v13, 1  ;;  %vm45_vm6 = vcmp.eq.s32.totalorder %v44_v12, 1 }
  0x85   :  { %v28_v21 = vsel %vm23_vm4, %v27_v15, 0.0 }
  0x87   :  { %v55_v18 = vpop.permute.xlu1 %54  ;;  %v33_v19 = vpop.permute.xlu0 %32 }
  0x88   :  { %vm34_vm5 = vcmp.eq.s32.totalorder %v33_v19, 1  ;;  %vm56_vm7 = vcmp.eq.s32.totalorder %v55_v18, 1 }
  0x89   :  { %v39_v22 = vsel %vm34_vm5, %v38_v16, %v28_v21 }
  0x8a   :  { %v50_v24 = vsel %vm45_vm6, %v49_v17, %v39_v22 }
  0x8b   :  { %v61_v25 = vsel %vm56_vm7, %v60_v20, %v50_v24 }
  0x8c   :  { %v62_v26 = vmul.f32 %v61_v25, %v16_v23 }
  0x8e   :  { %63 = vst [vmem:[#allocation2] sm:$0xff] %v62_v26 }
  0x8f   :  { %93 = shalt.err (!%p90_p4)
}
  0x90   :  { %s94_s21 = scalar_lea.hbm %s152_s3, 128 }
  0x91   :  { %p95_p5 = scmp.ne.s32.totalorder %s152_s3, %s94_s21  ;;  %p98_p6 = scmp.lt.u32.totalorder %s94_s21, %s152_s3 }
  0x93   :  { %p100_p7 = pnand %p98_p6, %p95_p5 }
  0x95   :  { %103 = shalt.err (!%p100_p7)
}
  0x96   :  { %73 = dma.vmem_to_hbm [thread:$0]  %s71_s17, 128, %s152_s3, [#allocation3]  }
  0x97   :  { %104 = dma.done.wait [#allocation3], 128  }
  0x98   :  { %105 = vsyncadd [#allocation3], 4294967168 }
  0x99   :  { %77 = vsyncpa [#allocation3], 1 }

</bundles_post_ra>
